<compile_context>
chip_gen: v5e
topology: v5e:2x2
jax: 0.10.0
libtpu: 0.0.40
codegen_flags: <defaults>
</compile_context>

<pallas_src>
import functools

import jax
import jax.numpy as jnp
from jax.experimental import pallas as pl
from jax.experimental.pallas import tpu as pltpu

_LANE = 128
_SUBLANE = 8
_NEG_BIG = -1e30  # bias for padded classes: exp() underflows to exactly 0 in f32


def _round_up(x, m):
    return (x + m - 1) // m * m


def mlp_kernel(x_ref, w1_ref, b1_ref, w2_ref, b2_ref, o_ref):
    # x: (TN, IN) f32 | w1: (IN, HID_P) bf16 | b1: (1, HID_P) f32
    # w2: (HID_P, OUT_P) bf16 | b2: (1, OUT_P) f32 | o: (TN, OUT_P) out_dtype
    x = x_ref[...].astype(jnp.bfloat16)   # in-kernel cast: no HBM pre-pass

    # Linear 1 (bf16 MXU operands, f32 accumulate) + bias + ReLU
    h = jnp.dot(x, w1_ref[...], preferred_element_type=jnp.float32) + b1_ref[...]
    h = jnp.maximum(h, 0.0)

    # TODO(synk): F.dropout(p, training=True) has no deterministic eval-mode
    # equivalent; inference semantics (identity) are implemented here.

    # Linear 2 (bf16 MXU operands, f32 accumulate) + bias
    logits = (
        jnp.dot(h.astype(jnp.bfloat16), w2_ref[...],
                preferred_element_type=jnp.float32)
        + b2_ref[...]
    )

    # log_softmax along dim=1 (numerically stable). Padded classes carry a
    # -1e30 bias, so exp() of them is 0 and they do not perturb the lse.
    m = jnp.max(logits, axis=1, keepdims=True)
    shifted = logits - m
    lse = jnp.log(jnp.sum(jnp.exp(shifted), axis=1, keepdims=True))
    o_ref[...] = (shifted - lse).astype(o_ref.dtype)


def _vmem_capacity_bytes():
    """Per-core VMEM capacity; conservative 64 MiB (v7x) fallback."""
    try:
        cap = int(pltpu.get_tpu_info().vmem_capacity_bytes)
        if cap > 0:
            return cap
    except Exception:
        pass
    return 64 << 20


def prepare_simple_mlp_params(w1, b1, w2, b2):
    """Pad hid/out to 128 lanes and cast weights to bf16.  Call ONCE at
    parameter setup; the results are reused by every forward call."""
    in_size, hid_size = w1.shape
    out_size = w2.shape[1]
    hid_p = _round_up(hid_size, _LANE)
    out_p = _round_up(out_size, _LANE)

    # Hidden dim: zero-padded weights/bias (relu(0)=0 contributes nothing).
    w1_p = jnp.zeros((in_size, hid_p), jnp.bfloat16).at[:, :hid_size].set(
        w1.astype(jnp.bfloat16))
    b1_p = jnp.zeros((1, hid_p), jnp.float32).at[0, :hid_size].set(
        b1.reshape(-1).astype(jnp.float32))
    # Output classes: zero weights + very negative bias => exp()==0 in softmax.
    w2_p = jnp.zeros((hid_p, out_p), jnp.bfloat16).at[:hid_size, :out_size].set(
        w2.astype(jnp.bfloat16))
    b2_p = jnp.full((1, out_p), _NEG_BIG, jnp.float32).at[0, :out_size].set(
        b2.reshape(-1).astype(jnp.float32))
    return (w1_p, b1_p, w2_p, b2_p), out_size


def _pick_row_tile(n_rows, in_size, hid_p, out_p, out_bytes,
                   vmem_budget_bytes, max_tile, min_grid_steps):
    """Largest row tile (multiple of 8) whose working set fits the budget,
    with >= min_grid_steps grid iterations when possible."""
    n8 = _round_up(max(n_rows, _SUBLANE), _SUBLANE)
    tn = min(_round_up(min(max_tile, n8), _SUBLANE), n8)
    if min_grid_steps > 1 and n8 >= min_grid_steps * _SUBLANE:
        # Guarantee multiple grid steps so the "parallel" axis can shard
        # across both v7x TensorCores.
        tn = min(tn, max(_SUBLANE, (n8 // min_grid_steps) // _SUBLANE * _SUBLANE))
    # Weights counted at 2x: BlockSpec double-buffers even constant index_maps.
    wbytes = 2 * ((in_size * hid_p + hid_p * out_p) * 2 + (hid_p + out_p) * 4)
    while tn > _SUBLANE:
        abytes = (2 * tn * in_size * 4            # double-buffered f32 feat tiles
                  + 2 * tn * out_p * out_bytes    # double-buffered output tiles
                  + 2 * tn * hid_p * 4)           # f32 hidden + logits intermediates
        if wbytes + abytes <= vmem_budget_bytes:
            break
        tn = max(_SUBLANE, _round_up(tn // 2, _SUBLANE))
    return tn


def simple_mlp_forward(feat, w1_p, b1_p, w2_p, b2_p, out_size, *,
                       out_dtype=jnp.float32):
    """feat: (N, in) any float dtype; padded params from prepare_simple_mlp_params."""
    N, in_size = feat.shape
    hid_p = w1_p.shape[1]
    out_p = w2_p.shape[1]
    out_bytes = jnp.dtype(out_dtype).itemsize

    # Generation-aware budgets (v5e/v6e: 128 MiB; v7x: 64 MiB per TC).
    vmem_cap = _vmem_capacity_bytes()
    small_vmem = vmem_cap <= (64 << 20)            # v7x-like: 2 TCs, 64 MiB/TC
    vmem_budget = min(int(vmem_cap * 0.70), 96 << 20)
    vmem_limit = min(int(vmem_cap * 0.75), 100 << 20)
    max_tile = 1024 if small_vmem else 512         # 512 hits the roofline plateau on v5e/v6e
    min_grid_steps = 2 if small_vmem else 1        # keep both v7x TensorCores busy

    tn = _pick_row_tile(N, in_size, hid_p, out_p, out_bytes,
                        vmem_budget, max_tile, min_grid_steps)
    n_pad = _round_up(N, tn)
    if n_pad != N:
        # Only the tail row tile is padded; rows are independent so this is exact.
        feat = jnp.pad(feat, ((0, n_pad - N), (0, 0)))

    grid = (n_pad // tn,)
    flops = 2 * n_pad * in_size * hid_p + 2 * n_pad * hid_p * out_p
    bytes_accessed = (n_pad * in_size * jnp.dtype(feat.dtype).itemsize
                      + w1_p.size * 2 + w2_p.size * 2
                      + b1_p.size * 4 + b2_p.size * 4
                      + n_pad * out_p * out_bytes)

    out_padded = pl.pallas_call(
        mlp_kernel,
        out_shape=jax.ShapeDtypeStruct((n_pad, out_p), out_dtype),
        grid=grid,
        in_specs=[
            pl.BlockSpec((tn, in_size), lambda i: (i, 0)),     # row-tiled f32 feats (no pre-pass)
            pl.BlockSpec((in_size, hid_p), lambda i: (0, 0)),  # resident W1 (bf16)
            pl.BlockSpec((1, hid_p), lambda i: (0, 0)),        # resident b1
            pl.BlockSpec((hid_p, out_p), lambda i: (0, 0)),    # resident W2 (bf16)
            pl.BlockSpec((1, out_p), lambda i: (0, 0)),        # resident b2
        ],
        out_specs=pl.BlockSpec((tn, out_p), lambda i: (i, 0)),  # lane-dense out
        compiler_params=pltpu.CompilerParams(
            dimension_semantics=("parallel",),   # megacore sharding on v7x
            vmem_limit_bytes=vmem_limit,
        ),
        cost_estimate=pl.CostEstimate(
            flops=flops,
            transcendentals=n_pad * out_p + n_pad,
            bytes_accessed=bytes_accessed,
        ),
    )(feat, w1_p, b1_p, w2_p, b2_p)

    # Strip row/class padding; squeeze() mirrors the PyTorch module's .squeeze().
    return jnp.squeeze(out_padded[:N, :out_size])


if __name__ == "__main__":
    # Small shapes consistent with the module: feat (N, in_size).
    N, in_size, hid_size, out_size = 8, 32, 64, 16

    key = jax.random.PRNGKey(0)
    k_x, k_w1, k_b1, k_w2, k_b2 = jax.random.split(key, 5)

    feat = jax.random.normal(k_x, (N, in_size), dtype=jnp.float32)

    # Deterministic parameter init (Kaiming-uniform-like scale, as nn.Linear).
    # Weights stored pre-transposed as (in, hid)/(hid, out) so x @ W matches
    # torch's x @ W.T + b semantics.
    bound1 = 1.0 / (in_size ** 0.5)
    w1 = jax.random.uniform(k_w1, (in_size, hid_size), jnp.float32, -bound1, bound1)
    b1 = jax.random.uniform(k_b1, (1, hid_size), jnp.float32, -bound1, bound1)
    bound2 = 1.0 / (hid_size ** 0.5)
    w2 = jax.random.uniform(k_w2, (hid_size, out_size), jnp.float32, -bound2, bound2)
    b2 = jax.random.uniform(k_b2, (1, out_size), jnp.float32, -bound2, bound2)

    # One-time parameter prep (padding + bf16 cast hoisted out of the forward path).
    (w1_p, b1_p, w2_p, b2_p), out_sz = prepare_simple_mlp_params(w1, b1, w2, b2)

    # jit the whole forward so any tail-row pad fuses with the pallas_call.
    fwd = jax.jit(functools.partial(simple_mlp_forward, out_size=out_sz))
    out = jax.block_until_ready(fwd(feat, w1_p, b1_p, w2_p, b2_p))

    # Pure-JAX reference replicating the kernel's bf16-operand / f32-accumulate math.
    xf = feat.astype(jnp.bfloat16).astype(jnp.float32)
    w1f = w1.astype(jnp.bfloat16).astype(jnp.float32)
    w2f = w2.astype(jnp.bfloat16).astype(jnp.float32)
    h_ref = jnp.maximum(xf @ w1f + b1, 0.0)
    h_ref = h_ref.astype(jnp.bfloat16).astype(jnp.float32)
    logits_ref = h_ref @ w2f + b2
    ref = jax.nn.log_softmax(logits_ref, axis=1)

    assert out.shape == (N, out_size), f"bad output shape {out.shape}"
    assert jnp.allclose(out, ref, atol=1e-3, rtol=1e-3), "mismatch vs reference"

    print("KERNEL_OK")
</pallas_src>

<mosaic_0001>
module attributes {stable_mosaic.version = 11 : i64} {
  func.func @mlp_kernel(%arg0: i32, %arg1: memref<8x32xf32, #tpu.memory_space<vmem>>, %arg2: memref<32x128xbf16, #tpu.memory_space<vmem>>, %arg3: memref<1x128xf32, #tpu.memory_space<vmem>>, %arg4: memref<128x128xbf16, #tpu.memory_space<vmem>>, %arg5: memref<1x128xf32, #tpu.memory_space<vmem>>, %arg6: memref<8x128xf32, #tpu.memory_space<vmem>>) attributes {dimension_semantics = [#tpu.dimension_semantics<parallel>], iteration_bounds = array<i64: 1>, scalar_prefetch = 0 : i64, scratch_operands = 0 : i64, tpu.core_type = #tpu.core_type<tc>, window_params = [{transform_indices = @transform_0, window_bounds = array<i64: 8, 32>}, {pipeline_mode = #tpu.pipeline_mode<synchronous>, transform_indices = @transform_1, window_bounds = array<i64: 32, 128>}, {pipeline_mode = #tpu.pipeline_mode<synchronous>, transform_indices = @transform_2, window_bounds = array<i64: 1, 128>}, {pipeline_mode = #tpu.pipeline_mode<synchronous>, transform_indices = @transform_3, window_bounds = array<i64: 128, 128>}, {pipeline_mode = #tpu.pipeline_mode<synchronous>, transform_indices = @transform_4, window_bounds = array<i64: 1, 128>}, {transform_indices = @transform_5, window_bounds = array<i64: 8, 128>}]} {
    %c0 = arith.constant 0 : index
    %c0_0 = arith.constant 0 : index
    %0 = vector.load %arg1[%c0, %c0_0] : memref<8x32xf32, #tpu.memory_space<vmem>>, vector<8x32xf32>
    %1 = arith.truncf %0 : vector<8x32xf32> to vector<8x32xbf16>
    %c0_1 = arith.constant 0 : index
    %c0_2 = arith.constant 0 : index
    %2 = vector.load %arg2[%c0_1, %c0_2] : memref<32x128xbf16, #tpu.memory_space<vmem>>, vector<32x128xbf16>
    %cst = arith.constant dense<0.000000e+00> : vector<8x128xf32>
    %3 = tpu.matmul %1, %2, %cst {dimension_numbers = #tpu.dot_dimension_numbers<[1], [0], [0], [1], [0, 0, 1, 1], [], []>} : vector<8x32xbf16>, vector<32x128xbf16>, vector<8x128xf32> -> vector<8x128xf32>
    %c0_3 = arith.constant 0 : index
    %c0_4 = arith.constant 0 : index
    %4 = vector.load %arg3[%c0_3, %c0_4] : memref<1x128xf32, #tpu.memory_space<vmem>>, vector<1x128xf32>
    %5 = vector.broadcast %4 : vector<1x128xf32> to vector<8x128xf32>
    %6 = arith.addf %3, %5 : vector<8x128xf32>
    %cst_5 = arith.constant 0.000000e+00 : f32
    %7 = vector.broadcast %cst_5 : f32 to vector<8x128xf32>
    %8 = arith.maximumf %6, %7 : vector<8x128xf32>
    %9 = arith.truncf %8 : vector<8x128xf32> to vector<8x128xbf16>
    %c0_6 = arith.constant 0 : index
    %c0_7 = arith.constant 0 : index
    %10 = vector.load %arg4[%c0_6, %c0_7] : memref<128x128xbf16, #tpu.memory_space<vmem>>, vector<128x128xbf16>
    %cst_8 = arith.constant dense<0.000000e+00> : vector<8x128xf32>
    %11 = tpu.matmul %9, %10, %cst_8 {dimension_numbers = #tpu.dot_dimension_numbers<[1], [0], [0], [1], [0, 0, 1, 1], [], []>} : vector<8x128xbf16>, vector<128x128xbf16>, vector<8x128xf32> -> vector<8x128xf32>
    %c0_9 = arith.constant 0 : index
    %c0_10 = arith.constant 0 : index
    %12 = vector.load %arg5[%c0_9, %c0_10] : memref<1x128xf32, #tpu.memory_space<vmem>>, vector<1x128xf32>
    %13 = vector.broadcast %12 : vector<1x128xf32> to vector<8x128xf32>
    %14 = arith.addf %11, %13 : vector<8x128xf32>
    %cst_11 = arith.constant dense<0xFF800000> : vector<8xf32>
    %15 = vector.multi_reduction <maximumf>, %14, %cst_11 [1] : vector<8x128xf32> to vector<8xf32>
    %16 = vector.shape_cast %15 : vector<8xf32> to vector<8x1xf32>
    %17 = vector.broadcast %16 : vector<8x1xf32> to vector<8x128xf32>
    %18 = arith.subf %14, %17 : vector<8x128xf32>
    %19 = math.exp %18 : vector<8x128xf32>
    %cst_12 = arith.constant dense<0.000000e+00> : vector<8xf32>
    %20 = vector.multi_reduction <add>, %19, %cst_12 [1] : vector<8x128xf32> to vector<8xf32>
    %21 = vector.shape_cast %20 : vector<8xf32> to vector<8x1xf32>
    %22 = math.log %21 : vector<8x1xf32>
    %23 = vector.broadcast %22 : vector<8x1xf32> to vector<8x128xf32>
    %24 = arith.subf %18, %23 : vector<8x128xf32>
    %c0_13 = arith.constant 0 : index
    %c0_14 = arith.constant 0 : index
    %25 = vector.load %arg6[%c0_13, %c0_14] : memref<8x128xf32, #tpu.memory_space<vmem>>, vector<8x128xf32>
    tpu.vector_store %arg6[%c0_13, %c0_14], %24 {strides = array<i32>} : memref<8x128xf32, #tpu.memory_space<vmem>>, vector<8x128xf32>,
    return
  }
  func.func @transform_0(%arg0: i32) -> (i32, i32) {
    %c0_i32 = arith.constant 0 : i32
    %c0_i32_0 = arith.constant 0 : i32
    return %arg0, %c0_i32 : i32, i32
  }
  func.func @transform_1(%arg0: i32) -> (i32, i32) {
    %c0_i32 = arith.constant 0 : i32
    %c0_i32_0 = arith.constant 0 : i32
    %c0_i32_1 = arith.constant 0 : i32
    return %c0_i32, %c0_i32_0 : i32, i32
  }
  func.func @transform_2(%arg0: i32) -> (i32, i32) {
    %c0_i32 = arith.constant 0 : i32
    %c0_i32_0 = arith.constant 0 : i32
    %c0_i32_1 = arith.constant 0 : i32
    return %c0_i32, %c0_i32_0 : i32, i32
  }
  func.func @transform_3(%arg0: i32) -> (i32, i32) {
    %c0_i32 = arith.constant 0 : i32
    %c0_i32_0 = arith.constant 0 : i32
    %c0_i32_1 = arith.constant 0 : i32
    return %c0_i32, %c0_i32_0 : i32, i32
  }
  func.func @transform_4(%arg0: i32) -> (i32, i32) {
    %c0_i32 = arith.constant 0 : i32
    %c0_i32_0 = arith.constant 0 : i32
    %c0_i32_1 = arith.constant 0 : i32
    return %c0_i32, %c0_i32_0 : i32, i32
  }
  func.func @transform_5(%arg0: i32) -> (i32, i32) {
    %c0_i32 = arith.constant 0 : i32
    %c0_i32_0 = arith.constant 0 : i32
    return %arg0, %c0_i32 : i32, i32
  }
}

</mosaic_0001>

<bundles_post_ra>
// kernel: simple_mlp_forward.1
= control target key start
LH: loop header
LB: loop body
LE: loop exit
PB: predicated region body
PF: predicated region fallthrough
CT: control target
= control target key end

     0   :  { %10 = vsyncpa [#allocation3], 0  ;;  %s437_s0 = inlined_call_operand.hbm [shape: f32[8,32], index: 0, kind: input, shape index: {}]   ;;  %s438_s1 = inlined_call_operand.hbm [shape: bf16[32,128], index: 1, kind: input, shape index: {}]   ;;  %s439_s2 = inlined_call_operand.vmem [shape: f32[1,128], index: 2, kind: input, shape index: {}]   ;;  %s440_s3 = inlined_call_operand.hbm [shape: bf16[128,128], index: 3, kind: input, shape index: {}]   ;;  %s441_s4 = inlined_call_operand.vmem [shape: f32[1,128], index: 4, kind: input, shape index: {}]   ;;  %s442_s5 = inlined_call_operand.hbm [shape: f32[8,128], index: 5, kind: output, shape index: {}]  }
   0x1   :  { %11 = vsyncpa [#allocation6], 0  ;;  %s28_s20 = sshll.u32 %s438_s1, 4  ;;  %s29_s20 = int_to_ptr.hbm [resolvable:$true] %s28_s20 }
   0x2   :  { %12 = vsyncpa [#allocation4], 0  ;;  %s383_s21 = smov [#allocation5]   ;;  %s18_s25 = sshll.u32 %s437_s0, 4  ;;  %s19_s25 = int_to_ptr.hbm [resolvable:$true] %s18_s25 }
   0x3   :  { %s30_s22 = sshll.u32 %s383_s21, 4  ;;  %s384_s26 = smov 64   ;;  %s31_s22 = int_to_ptr.vmem [resolvable:$true] %s30_s22 }
   0x4   :  { %s385_s27 = smov 4   ;;  %s386_s28 = smov [#allocation2]  }
   0x5   :  { %36 = dma.hbm_to_vmem [thread:$0]  %s29_s20, 256, %s31_s22, [#allocation6], %s384_s26, %s384_s26, %s385_s27  }
   0x6   :  { %s20_s29 = sshll.u32 %s386_s28, 4  ;;  %s43_s7 = sshll.u32 %s440_s3, 4  ;;  %s21_s29 = int_to_ptr.vmem [resolvable:$true] %s20_s29  ;;  %s44_s7 = int_to_ptr.hbm [resolvable:$true] %s43_s7 }
   0x7   :  { %23 = dma.hbm_to_vmem [thread:$0]  %s19_s25, 128, %s21_s29, [#allocation3]  }
   0x8   :  { %s387_s1 = smov [#allocation7]  }
   0x9   :  { %s45_s8 = sshll.u32 %s387_s1, 4  ;;  %s46_s8 = int_to_ptr.vmem [resolvable:$true] %s45_s8 }
   0xa   :  { %51 = dma.hbm_to_vmem [thread:$0]  %s44_s7, 1024, %s46_s8, [#allocation6], %s384_s26, %s384_s26, %s385_s27  }
   0xb   :  { %377 = dma.done.wait [#allocation3], 128  }
   0xc   :  { %378 = vsyncadd [#allocation3], 4294967168 }
   0xd   :  { %379 = dma.done.wait [#allocation6], 1280  }
   0xe   :  { %380 = vsyncadd [#allocation6], 4294966016  ;;  %v260_v0 = vld [vmem:[#allocation5 + $0x8] sm:$0xff]  ;;  %v259_v2 = vld [vmem:[#allocation5] sm:$0xff]  ;;  %vm89_vm0 = vcmask 261120   ;;  %s207_s14 = sshll.u32 %s442_s5, 4  ;;  %s208_s14 = int_to_ptr.hbm [resolvable:$true] %s207_s14 }
   0xf   :  { %v268_v1 = vld [vmem:[#allocation7 + $0x38] sm:$0xff]  ;;  %99 = vmatpush.bf16.msra.mxu0 %v260_v0  ;;  %v67_v3 = vld [vmem:[#allocation2] sm:$0xff]  ;;  %v267_v4 = vld [vmem:[#allocation7 + $0x30] sm:$0xff] }
  0x10   :  { %176 = vmatpush.bf16.msra.mxu1 %v268_v1  ;;  %v68_v5 = vpack.c.bf16 %v67_v3, %v67_v3  ;;  %v266_v6 = vld [vmem:[#allocation7 + $0x28] sm:$0xff]  ;;  %v265_v7 = vld [vmem:[#allocation7 + $0x20] sm:$0xff]  ;;  %v264_v8 = vld [vmem:[#allocation7 + $0x18] sm:$0xff] }
  0x11   :  { %v263_v9 = vld [vmem:[#allocation7 + $0x10] sm:$0xff]  ;;  %v262_v10 = vld [vmem:[#allocation7 + $0x8] sm:$0xff]  ;;  %v261_v11 = vld [vmem:[#allocation7] sm:$0xff] }
  0x12   :  { %v275_v12 = vld [vmem:[%s439_s2] ss:$0 sm:$0xff]  ;;  %s388_s2 = smov [#allocation8]  }
  0x13   :  { %100 = vmatpush.bf16.msra.mxu0 %v259_v2  ;;  %v276_v18 = vld [vmem:[%s441_s4] ss:$0 sm:$0xff]  ;;  %s205_s11 = sshll.u32 %s388_s2, 4  ;;  %s206_s11 = int_to_ptr.vmem [resolvable:$true] %s205_s11 }
  0x14   :  { %177 = vmatpush.bf16.msra.mxu1 %v267_v4 }
  0x16   :  { %226 = vmatmul.msk.bf16.vlgmr.msra.gmra.mxu0 %vm89_vm0, %v68_v5 }
  0x18   :  { %178 = vmatpush.bf16.msra.mxu1 %v266_v6 }
  0x1c   :  { %179 = vmatpush.bf16.msra.mxu1 %v265_v7 }
  0x20   :  { %180 = vmatpush.bf16.msra.mxu1 %v264_v8 }
  0x24   :  { %181 = vmatpush.bf16.msra.mxu1 %v263_v9 }
  0x28   :  { %182 = vmatpush.bf16.msra.mxu1 %v262_v10 }
  0x2c   :  { %183 = vmatpush.bf16.msra.mxu1 %v261_v11 }
  0x93   :  { %v102_v13 = vpop.f32.mrf.mxu0 }
  0x94   :  { %v103_v14 = vadd.f32 %v275_v12, %v102_v13 }
  0x96   :  { %v106_v15 = vmax.f32 %v103_v14, 0.0 }
  0x98   :  { %v107_v16 = vpack.c.bf16 %v106_v15, %v106_v15 }
  0x9a   :  { %184 = vmatmul.bf16.vlgmr.msra.gmra.mxu1 %v107_v16 }
  0x9b   :  { %v104_v17 = vpop.f32.mrf.mxu0 }
 0x117   :  { %v185_v19 = vpop.f32.mrf.mxu1 }
 0x118   :  { %v186_v20 = vadd.f32 %v276_v18, %v185_v19 }
 0x11a   :  { %189 = vmax.xlane.f32.xlu0 %v186_v20 }
 0x11f   :  { %v187_v21 = vpop.f32.mrf.mxu1 }
 0x18d   :  { %v190_v22 = vpop.xlane.xlu0 %189 }
 0x18e   :  { %v191_v23 = vsub.f32 %v186_v20, %v190_v22 }
 0x190   :  { %v192_v24 = vmul.f32 1.442695, %v191_v23 }
 0x192   :  { %277 = vpow2.f32 %v192_v24 }
 0x198   :  { %v278_v25 = vpop.eup %277 }
 0x199   :  { %194 = vadd.xlane.f32.xlu0 %v278_v25 }
 0x20c   :  { %v195_v26 = vpop.xlane.xlu0 %194 }
 0x20d   :  { %279 = vlog2.f32 %v195_v26 }
 0x213   :  { %v280_v27 = vpop.eup %279 }
 0x214   :  { %v197_v28 = vmul.f32 0.6931472, %v280_v27 }
 0x216   :  { %v198_v29 = vsub.f32 %v191_v23, %v197_v28 }
 0x218   :  { %199 = vst [vmem:[#allocation8] sm:$0xff] %v198_v29 }
 0x219   :  { %210 = dma.vmem_to_hbm [thread:$0]  %s206_s11, 128, %s208_s14, [#allocation4]  }
 0x21a   :  { %381 = dma.done.wait [#allocation4], 128  }
 0x21b   :  { %382 = vsyncadd [#allocation4], 4294967168 }
 0x21c   :  { %215 = vsyncpa [#allocation3], 1 }
 0x21d   :  { %216 = vsyncpa [#allocation6], 1 }
 0x21e   :  { %217 = vsyncpa [#allocation4], 1 }

</bundles_post_ra>
